<compile_context>
chip_gen: v7x
topology: tpu7x:2x2x1
jax: 0.10.0
libtpu: 0.0.40
codegen_flags: <defaults>
</compile_context>

<pallas_src>
import jax
import jax.numpy as jnp
from jax.experimental import pallas as pl
from jax.experimental.pallas import tpu as pltpu

LANES = 128      # TPU lane width (minor vreg dim)
SUBLANES = 8     # TPU sublane count


# --------------------- Kernel 1: fuse  u = W_emb^T @ w + b ---------------------------
def _make_fuse_kernel(n_items: int, tn: int):
    def fuse_kernel(emb_ref, w_ref, b_ref, u_ref):
        # emb_ref: [h_dim, tn] VMEM (native W_emb layout, any float dtype)
        # w_ref:   [h_dim, 1]  VMEM f32
        # b_ref:   [1, 1]      SMEM f32
        # u_ref:   [1, tn]     VMEM f32
        e = emb_ref[...].astype(jnp.float32)            # in-register cast (bf16 tables ok)
        w = w_ref[...]                                  # [h_dim, 1], lane-broadcast in mul
        # VPU multiply + sublane reduction (deliberately NOT an N=1 MXU matmul).
        u = jnp.sum(e * w, axis=0, keepdims=True) + b_ref[0, 0]      # [1, tn]
        # Mask lanes past the real table: partial last block reads garbage from HBM pad.
        gl = pl.program_id(0) * tn + jax.lax.broadcasted_iota(jnp.int32, (1, tn), 1)
        u_ref[...] = jnp.where(gl < n_items, u, 0.0)
    return fuse_kernel


def _fuse_table(emb, w_col, b_2d, *, block_bytes=4 << 20):
    """u[i] = sum_h emb[h, i] * w_col[h, 0] + b, emitted lane-dense as [n_chunks, 128]."""
    h_dim, n_items = emb.shape
    n_chunks = pl.cdiv(n_items, LANES)
    lanes_pad = n_chunks * LANES
    esize = emb.dtype.itemsize
    # Chunks of 128 item-columns per block, capped so a double-buffered input block stays
    # well inside every generation's scoped-VMEM default (incl. v7x's 64 MiB physical).
    cpb = max(1, min(n_chunks, block_bytes // max(1, h_dim * LANES * esize)))
    tn = cpb * LANES
    n_blocks = pl.cdiv(n_chunks, cpb)

    u = pl.pallas_call(
        _make_fuse_kernel(n_items, tn),
        out_shape=jax.ShapeDtypeStruct((1, lanes_pad), jnp.float32),
        grid=(n_blocks,),
        in_specs=[
            pl.BlockSpec((h_dim, tn), lambda j: (0, j)),          # stream table natively
            pl.BlockSpec((h_dim, 1), lambda j: (0, 0)),           # linear weight (tiny)
            pl.BlockSpec(memory_space=pltpu.MemorySpace.SMEM),    # scalar bias
        ],
        out_specs=pl.BlockSpec((1, tn), lambda j: (0, j)),
        compiler_params=pltpu.CompilerParams(dimension_semantics=("parallel",)),
        cost_estimate=pl.CostEstimate(
            flops=2 * n_items * h_dim,
            transcendentals=0,
            bytes_accessed=n_items * h_dim * esize + lanes_pad * 4 + h_dim * 4),
    )(emb, w_col, b_2d)
    # Tiny relayout (n_chunks * 512 B, << table traffic) so the gather can index chunks
    # on the sublane axis.
    return u.reshape(n_chunks, LANES)


# --------------------- Kernel 2: lane-dense gather  y = u[items] ---------------------
def _make_gather_kernel(n_chunks: int):
    def gather_kernel(items_ref, u_ref, out_ref):
        idx = items_ref[...]                                   # [tile_rows, 128] int32
        lane = jnp.bitwise_and(idx, LANES - 1)                 # always in [0,128): safe
        if n_chunks == 1:
            row = jnp.broadcast_to(u_ref[...], idx.shape)      # u_ref: [1, 128]
            out_ref[...] = jnp.take_along_axis(row, lane, axis=-1)
        else:
            chunk = jnp.right_shift(idx, 7)                    # items // 128

            def body(c, acc):
                row = jnp.broadcast_to(u_ref[pl.ds(c, 1), :], acc.shape)
                vals = jnp.take_along_axis(row, lane, axis=-1)
                return jnp.where(chunk == c, vals, acc)

            # fori_loop (not a static Python unroll) bounds code size / live ranges;
            # fully unroll only for small chunk counts.
            out_ref[...] = jax.lax.fori_loop(
                0, n_chunks, body, jnp.zeros(idx.shape, jnp.float32),
                unroll=(n_chunks <= 8))
    return gather_kernel


# ----------------------------------- wrapper -----------------------------------------
def utility_encoder_forward(users, items, w_emb, w_lin, b_lin, *,
                            fuse_block_bytes=4 << 20):
    """Forward pass of UtilityEncoder.

    users: [B, S]            (unused; kept for parity with the PyTorch forward)
    items: [B, S] int        item ids in [0, n_items)
    w_emb: [h_dim, n_items]  EmbeddingGrad table in its native nn.Linear layout
    w_lin: [1, h_dim]        output linear weight (nn.Linear(h_dim, 1).weight)
    b_lin: [1] or scalar     output linear bias
    returns: [B, S, 1] float32
    """
    del users  # unused by the PyTorch forward as well
    B, S = items.shape
    h_dim, n_items = w_emb.shape
    M = B * S
    n_chunks = pl.cdiv(n_items, LANES)

    # -- Kernel 1 (one pass over the table): u = W_emb^T @ W_lin^T + b ---------------
    w_col = w_lin.reshape(h_dim, 1).astype(jnp.float32)
    b_2d = jnp.asarray(b_lin, jnp.float32).reshape(1, 1)
    u = _fuse_table(w_emb, w_col, b_2d, block_bytes=fuse_block_bytes)   # [n_chunks, 128]

    # -- Kernel 2: M-tiled lane-dense gather ------------------------------------------
    items_flat = items.reshape(-1).astype(jnp.int32)
    pad = (-M) % LANES
    if pad:                                           # only pay a pad when M is ragged
        items_flat = jnp.pad(items_flat, (0, pad))
    rows = (M + pad) // LANES
    items_2d = items_flat.reshape(rows, LANES)

    tile_rows = min(512, rows)                        # big tiles amortize per-step overhead
    n_tiles = pl.cdiv(rows, tile_rows)

    y2d = pl.pallas_call(
        _make_gather_kernel(n_chunks),
        out_shape=jax.ShapeDtypeStruct((rows, LANES), jnp.float32),
        grid=(n_tiles,),
        in_specs=[
            pl.BlockSpec((tile_rows, LANES), lambda i: (i, 0)),   # item-id tiles
            pl.BlockSpec((n_chunks, LANES), lambda i: (0, 0)),    # u resident across grid
        ],
        out_specs=pl.BlockSpec((tile_rows, LANES), lambda i: (i, 0)),
        compiler_params=pltpu.CompilerParams(
            dimension_semantics=("parallel",)),        # v7x: both TCs split row tiles
        cost_estimate=pl.CostEstimate(
            flops=2 * rows * LANES * max(1, n_chunks),
            transcendentals=0,
            bytes_accessed=rows * LANES * 8 + n_chunks * LANES * 4),
    )(items_2d, u)

    y_flat = y2d.reshape(-1)
    if pad:
        y_flat = y_flat[:M]
    return y_flat.reshape(B, S, 1)


def init_params(key, n_items, h_dim):
    """Deterministic init mirroring nn.Linear defaults (uniform +/- 1/sqrt(fan_in))."""
    k1, k2, k3 = jax.random.split(key, 3)
    bound_e = 1.0 / jnp.sqrt(float(n_items))
    w_emb = jax.random.uniform(k1, (h_dim, n_items), jnp.float32, -bound_e, bound_e)
    bound_l = 1.0 / jnp.sqrt(float(h_dim))
    w_lin = jax.random.uniform(k2, (1, h_dim), jnp.float32, -bound_l, bound_l)
    b_lin = jax.random.uniform(k3, (1,), jnp.float32, -bound_l, bound_l)
    return w_emb, w_lin, b_lin


if __name__ == "__main__":
    key = jax.random.PRNGKey(0)
    # (n_items, h_dim, B, S, fuse_block_bytes): exercises the single-chunk path, the
    # multi-chunk unrolled path with ragged M, and the multi-block fuse + dynamic
    # (non-unrolled) chunk loop path.
    configs = [
        (16, 32, 2, 8, 4 << 20),
        (300, 32, 3, 50, 4 << 20),
        (1300, 32, 4, 100, 64 << 10),
    ]
    for n_items, h_dim, batch, seq, fbb in configs:
        key, k_param, k_items = jax.random.split(key, 3)
        w_emb, w_lin, b_lin = init_params(k_param, n_items, h_dim)

        users = jnp.zeros((batch, seq), dtype=jnp.int32)   # unused (parity only)
        items = jax.random.randint(k_items, (batch, seq), 0, n_items, dtype=jnp.int32)

        y_hat = utility_encoder_forward(users, items, w_emb, w_lin, b_lin,
                                        fuse_block_bytes=fbb)
        y_hat = jax.block_until_ready(y_hat)

        # Plain-JAX reference: embedding lookup + linear.
        ref = jnp.take(w_emb.T, items, axis=0) @ w_lin.T + b_lin      # [B, S, 1]
        assert y_hat.shape == (batch, seq, 1)
        assert jnp.allclose(y_hat, ref, atol=1e-5, rtol=1e-5), (n_items, h_dim)

    print("KERNEL_OK")
</pallas_src>

<mosaic_0001>
module attributes {stable_mosaic.version = 11 : i64} {
  func.func @fuse_kernel(%arg0: i32, %arg1: memref<32x128xf32, #tpu.memory_space<vmem>>, %arg2: memref<32x1xf32, #tpu.memory_space<vmem>>, %arg3: memref<1x1xf32, #tpu.memory_space<smem>>, %arg4: memref<1x128xf32, #tpu.memory_space<vmem>>) attributes {dimension_semantics = [#tpu.dimension_semantics<parallel>], iteration_bounds = array<i64: 1>, scalar_prefetch = 0 : i64, scratch_operands = 0 : i64, tpu.core_type = #tpu.core_type<tc>, window_params = [{transform_indices = @transform_0, window_bounds = array<i64: 32, 128>}, {pipeline_mode = #tpu.pipeline_mode<synchronous>, transform_indices = @transform_1, window_bounds = array<i64: 32, 1>}, {transform_indices = @transform_2, window_bounds = array<i64: 1, 1>}, {transform_indices = @transform_3, window_bounds = array<i64: 1, 128>}]} {
    %c0 = arith.constant 0 : index
    %c0_0 = arith.constant 0 : index
    %0 = vector.load %arg1[%c0, %c0_0] : memref<32x128xf32, #tpu.memory_space<vmem>>, vector<32x128xf32>
    %c0_1 = arith.constant 0 : index
    %c0_2 = arith.constant 0 : index
    %1 = vector.load %arg2[%c0_1, %c0_2] : memref<32x1xf32, #tpu.memory_space<vmem>>, vector<32x1xf32>
    %2 = vector.broadcast %1 : vector<32x1xf32> to vector<32x128xf32>
    %3 = arith.mulf %0, %2 : vector<32x128xf32>
    %cst = arith.constant dense<0.000000e+00> : vector<128xf32>
    %4 = vector.multi_reduction <add>, %3, %cst [0] : vector<32x128xf32> to vector<128xf32>
    %5 = vector.shape_cast %4 : vector<128xf32> to vector<1x128xf32>
    %c0_3 = arith.constant 0 : index
    %c0_4 = arith.constant 0 : index
    %6 = memref.load %arg3[%c0_3, %c0_4] : memref<1x1xf32, #tpu.memory_space<smem>>
    %7 = vector.broadcast %6 : f32 to vector<1x128xf32>
    %8 = arith.addf %5, %7 : vector<1x128xf32>
    %c128_i32 = arith.constant 128 : i32
    %9 = arith.muli %arg0, %c128_i32 : i32
    %10 = tpu.iota {dimensions = array<i32: 1>} : vector<1x128xi32>
    %11 = vector.broadcast %9 : i32 to vector<1x128xi32>
    %12 = arith.addi %11, %10 : vector<1x128xi32>
    %c16_i32 = arith.constant 16 : i32
    %13 = vector.broadcast %c16_i32 : i32 to vector<1x128xi32>
    %14 = arith.cmpi slt, %12, %13 : vector<1x128xi32>
    %cst_5 = arith.constant 0.000000e+00 : f32
    %15 = vector.broadcast %cst_5 : f32 to vector<1x128xf32>
    %16 = arith.select %14, %8, %15 : vector<1x128xi1>, vector<1x128xf32>
    %c0_6 = arith.constant 0 : index
    %c0_7 = arith.constant 0 : index
    %17 = vector.load %arg4[%c0_6, %c0_7] : memref<1x128xf32, #tpu.memory_space<vmem>>, vector<1x128xf32>
    tpu.vector_store %arg4[%c0_6, %c0_7], %16 {strides = array<i32>} : memref<1x128xf32, #tpu.memory_space<vmem>>, vector<1x128xf32>,
    return
  }
  func.func @transform_0(%arg0: i32) -> (i32, i32) {
    %c0_i32 = arith.constant 0 : i32
    %c0_i32_0 = arith.constant 0 : i32
    return %c0_i32, %arg0 : i32, i32
  }
  func.func @transform_1(%arg0: i32) -> (i32, i32) {
    %c0_i32 = arith.constant 0 : i32
    %c0_i32_0 = arith.constant 0 : i32
    %c0_i32_1 = arith.constant 0 : i32
    return %c0_i32, %c0_i32_0 : i32, i32
  }
  func.func @transform_2(%arg0: i32) -> (i32, i32) {
    %c0_i32 = arith.constant 0 : i32
    %c0_i32_0 = arith.constant 0 : i32
    %c0_i32_1 = arith.constant 0 : i32
    return %c0_i32, %c0_i32_0 : i32, i32
  }
  func.func @transform_3(%arg0: i32) -> (i32, i32) {
    %c0_i32 = arith.constant 0 : i32
    %c0_i32_0 = arith.constant 0 : i32
    return %c0_i32, %arg0 : i32, i32
  }
}

</mosaic_0001>

<bundles_post_ra>
// kernel: tpu_custom_call.1
= control target key start
LH: loop header
LB: loop body
LE: loop exit
PB: predicated region body
PF: predicated region fallthrough
CT: control target
= control target key end

     0   :  { %v110_v2 = vmov 0   ;;  %s171_s0 = inlined_call_operand.vmem [shape: f32[32,16], index: 0, kind: input, shape index: {}]   ;;  %s172_s1 = inlined_call_operand.vmem [shape: f32[32,1], index: 1, kind: input, shape index: {}]   ;;  %s173_s2 = inlined_call_operand.<no memory space> [shape: f32[1,1], index: 2, kind: input, shape index: {}]   ;;  %s174_s3 = inlined_call_operand.hbm [shape: f32[1,128], index: 3, kind: output, shape index: {}]  }
   0x1   :  { %v22_v0 = vld [vmem:[%s172_s1 + $0x10] sm:$0xff]  ;;  %v20_v1 = vld [vmem:[%s172_s1] sm:$0xff]  ;;  %85 = vset.pattern.permute.xlu1 %v110_v2  ;;  %84 = vset.pattern.permute.xlu0 %v110_v2 }
   0x2   :  { %36 = vperm.xlu1 %85, %v22_v0   ;;  %26 = vperm.xlu0 %84, %v20_v1  }
   0x3   :  { %9 = vsyncpa [#allocation4], 0  ;;  %v23_v3 = vld [vmem:[%s172_s1 + $0x18] sm:$0xff]  ;;  %v21_v4 = vld [vmem:[%s172_s1 + $0x8] sm:$0xff]  ;;  %v61_v22 = vlaneseq  ;;  %v58_v27 = vstv %s173_s2  ;;  %s111_s29 = smov [#allocation3]  }
   0x4   :  { %v16_v7 = vld [vmem:[%s171_s0] sm:$0xff]  ;;  %v17_v8 = vld [vmem:[%s171_s0 + $0x8] sm:$0xff]  ;;  %v18_v9 = vld [vmem:[%s171_s0 + $0x10] sm:$0xff]  ;;  %s74_s30 = sshll.u32 %s111_s29, 4  ;;  %s75_s30 = int_to_ptr.vmem [resolvable:$true] %s74_s30 }
   0x5   :  { %v19_v14 = vld [vmem:[%s171_s0 + $0x18] sm:$0xff]  ;;  %v62_v25 = vand.u32 127, %v61_v22  ;;  %s86_s0 = scalar_lea.vmem %s75_s30, 16  ;;  %s90_s4 = scalar_lea.vmem %s75_s30, 32 }
   0x6   :  { %41 = vperm.xlu1 %85, %v23_v3   ;;  %31 = vperm.xlu0 %84, %v21_v4   ;;  %p87_p0 = scmp.ne.s32.totalorder %s75_s30, %s86_s0  ;;  %p91_p1 = scmp.lt.s32.totalorder %s75_s30, %s75_s30 }
   0x7   :  { %vm65_vm0 = vcmp.lt.s32.totalorder %v62_v25, 16  ;;  %p92_p2 = scmp.lt.s32.totalorder %s90_s4, %s86_s0 }
   0x9   :  { %p93_p3 = por %p92_p2, %p91_p1 }
   0xb   :  { %p94_p4 = pnand %p93_p3, %p87_p0 }
  0x81   :  { %v37_v5 = vpop.permute.xlu1 %36  ;;  %v27_v6 = vpop.permute.xlu0 %26 }
  0x82   :  { %v44_v11 = vmul.f32 %v27_v6, %v16_v7  ;;  %v46_v15 = vmul.f32 %v37_v5, %v18_v9 }
  0x85   :  { %v32_v10 = vpop.permute.xlu0 %31  ;;  %v42_v13 = vpop.permute.xlu1 %41 }
  0x86   :  { %v45_v12 = vmul.f32 %v32_v10, %v17_v8  ;;  %v47_v17 = vmul.f32 %v42_v13, %v19_v14 }
  0x88   :  { %v48_v16 = vadd.f32 %v45_v12, %v44_v11 }
  0x8a   :  { %v49_v18 = vadd.f32 %v48_v16, %v46_v15 }
  0x8c   :  { %v50_v19 = vadd.f32 %v49_v18, %v47_v17 }
  0x8e   :  { %v51_v20 = vrot.slane %v50_v19, 4 }
  0x90   :  { %v52_v21 = vadd.f32 %v51_v20, %v50_v19 }
  0x92   :  { %v53_v23 = vrot.slane %v52_v21, 2 }
  0x94   :  { %v54_v24 = vadd.f32 %v53_v23, %v52_v21 }
  0x96   :  { %v55_v26 = vrot.slane %v54_v24, 1 }
  0x98   :  { %v56_v28 = vadd.f32 %v55_v26, %v54_v24 }
  0x9a   :  { %v59_v29 = vadd.f32 %v58_v27, %v56_v28 }
  0x9c   :  { %v66_v30 = vsel %vm65_vm0, %v59_v29, 0.0 }
  0x9d   :  { %67 = vst [vmem:[#allocation3] sm:$0x1] %v66_v30 }
  0x9e   :  { %97 = shalt.err (!%p94_p4)
}
  0x9f   :  { %s98_s2 = scalar_lea.hbm %s174_s3, 16 }
  0xa0   :  { %p99_p5 = scmp.ne.s32.totalorder %s174_s3, %s98_s2  ;;  %p102_p6 = scmp.lt.u32.totalorder %s98_s2, %s174_s3 }
  0xa2   :  { %p104_p7 = pnand %p102_p6, %p99_p5 }
  0xa4   :  { %107 = shalt.err (!%p104_p7)
}
  0xa5   :  { %77 = dma.vmem_to_hbm [thread:$0]  %s75_s30, 16, %s174_s3, [#allocation4]  }
  0xa6   :  { %108 = dma.done.wait [#allocation4], 16  }
  0xa7   :  { %109 = vsyncadd [#allocation4], 4294967280 }
  0xa8   :  { %81 = vsyncpa [#allocation4], 1 }

</bundles_post_ra>
